<compile_context>
chip_gen: v7x
topology: tpu7x:2x2x1
jax: 0.10.0
libtpu: 0.0.40
codegen_flags: <defaults>
</compile_context>

<pallas_src>
import jax
import jax.numpy as jnp
from jax.experimental import pallas as pl
from jax.experimental.pallas import tpu as pltpu


def _round_up(n: int, m: int) -> int:
    return ((n + m - 1) // m) * m


def _fused_kernel(x_ref, wc_ref, b1_ref, v_ref, b2_ref, o_ref):
    # x_ref:  (P*Pout, TB, Cin*K)   im2col activation  (compute dtype)
    # wc_ref: (P*Pout, Cin*K, Cout) conv weight, replicated on the leading axis
    # b1_ref: (1, Cout)             conv bias (f32)
    # v_ref:  (Pout, Cout, Jp)      fc weight (flatten order + pool stride folded in)
    # b2_ref: (1, Jp)               fc bias (f32, zero padded to 128 lanes)
    # o_ref:  (TB, Jp)
    PP, TB, _ = x_ref.shape
    Pout, Cout, Jp = v_ref.shape
    P = PP // Pout

    # Conv1d (valid) as one batched MXU matmul, f32 accumulation.
    y = jnp.einsum("gbf,gfc->gbc", x_ref[...], wc_ref[...],
                   preferred_element_type=jnp.float32)          # (PP, TB, Cout)
    y = jnp.maximum(y + b1_ref[...], 0.0)                        # bias + ReLU (VPU, f32)

    # MaxPool1d(P, stride=P): split g = p*Pout + j on the leading axis, max over p.
    pooled = jnp.max(y.reshape(P, Pout, TB, Cout), axis=0)       # (Pout, TB, Cout)

    # Flatten + Linear: one batched matmul over pool positions + leading-axis sum.
    pooled = pooled.astype(v_ref.dtype)
    part = jnp.einsum("jbc,jco->jbo", pooled, v_ref[...],
                      preferred_element_type=jnp.float32)        # (Pout, TB, Jp)
    o_ref[...] = (jnp.sum(part, axis=0) + b2_ref[...]).astype(o_ref.dtype)


def cnn1d_maxpool_linear(x_ncl, conv_w, conv_b, fc_w, fc_b, pool_kernel,
                         compute_dtype=jnp.bfloat16):
    """x_ncl: (B, Cin, L) float32 (PyTorch NCW layout).  Returns (B, Jout) f32."""
    B, Cin, L = x_ncl.shape
    Cout, Cin_w, K = conv_w.shape
    assert Cin_w == Cin
    Jout, Fin = fc_w.shape
    P = int(pool_kernel)
    Lout = L - K + 1
    assert Lout >= P
    Pout = (Lout - P) // P + 1
    assert Fin == Cout * Pout
    CinK = Cin * K
    PP = P * Pout
    Jp = _round_up(Jout, 128)
    f32 = jnp.float32

    # ---- parameter preprocessing (tiny, fully vectorized, no scatter loops) ---
    # Conv weight: wc[ci*K + k, co] = conv_w[co, ci, k]; replicated P*Pout times
    # on a leading axis so the conv is a single batched matmul (a few KiB).
    wc = jnp.transpose(conv_w.astype(f32), (1, 2, 0)).reshape(CinK, Cout)
    wcb = jnp.broadcast_to(wc.astype(compute_dtype)[None], (PP, CinK, Cout))
    b1 = conv_b.astype(f32).reshape(1, Cout)
    # FC weight with PyTorch's x.view(B, -1) order (feature = c*Pout + j) and the
    # pooling stride folded into the layout: V[j, c, o] = fc_w[o, c*Pout + j].
    v = jnp.transpose(fc_w.astype(f32).reshape(Jout, Cout, Pout), (2, 1, 0))
    v = jnp.pad(v, ((0, 0), (0, 0), (0, Jp - Jout))).astype(compute_dtype)
    b2 = jnp.pad(fc_b.astype(f32), (0, Jp - Jout)).reshape(1, Jp)

    # ---- im2col activation: (P*Pout, B, Cin*K) --------------------------------
    # xcol[p*Pout + j, b, ci*K + k] = x[b, ci, j*P + p + k]; only the Pout*P conv
    # positions the pool actually consumes are materialized.
    Lcov = Pout * P
    cols = jnp.stack([x_ncl[:, :, k:k + Lcov] for k in range(K)], axis=-1)
    cols = cols.reshape(B, Cin, Pout, P, K)
    xcol = jnp.transpose(cols, (3, 2, 0, 1, 4)).reshape(PP, B, CinK)
    xcol = xcol.astype(compute_dtype)
    # TODO(synk): for long sequences, gather the K-wide windows inside the kernel
    # from the native (B, L, Cin) layout instead of duplicating x by a factor K.

    # ---- generation-aware batch tiling -----------------------------------------
    kind = ""
    try:
        kind = jax.devices()[0].device_kind.lower()
    except Exception:
        pass
    multi_tc = ("v7" in kind) or ("v5p" in kind) or ("v4" in kind)

    if B <= 8:
        TB = 8
    elif multi_tc:
        n_tiles = max(2, -(-B // 256))            # >=2 tiles -> feed both TensorCores
        TB = min(256, _round_up(-(-B // n_tiles), 8))
    else:
        n_tiles = -(-B // 512)                    # single TC: fewest grid steps
        TB = min(512, _round_up(-(-B // n_tiles), 8))

    op_bytes = jnp.dtype(compute_dtype).itemsize
    vmem_cap = (48 << 20) if "v7" in kind else (100 << 20)

    def vmem_estimate(tb):
        lane = lambda n: _round_up(n, 128)
        sub8 = lambda n: _round_up(n, 8)
        x_blk = PP * tb * lane(CinK) * op_bytes             # one x buffer
        o_blk = tb * Jp * 4                                 # one out buffer
        consts = (PP * sub8(CinK) * lane(Cout) * op_bytes   # conv weight
                  + Pout * sub8(Cout) * Jp * op_bytes       # fc weight
                  + sub8(1) * lane(Cout) * 4 + sub8(1) * Jp * 4)
        temps = (PP * tb * lane(Cout) * 4                   # conv out (f32)
                 + Pout * tb * lane(Cout) * (4 + op_bytes)  # pooled + bf16 copy
                 + Pout * tb * Jp * 4                       # fc partials
                 + tb * Jp * 4)
        return int((2 * (x_blk + o_blk) + 2 * consts + temps) * 1.25) + (2 << 20)

    while TB > 8 and vmem_estimate(TB) > vmem_cap:
        TB = max(8, _round_up(TB // 2, 8))
    vmem_limit = int(min(vmem_cap, max(vmem_estimate(TB), 32 << 20)))

    Bp = _round_up(B, TB)
    if Bp != B:
        xcol = jnp.pad(xcol, ((0, 0), (0, Bp - B), (0, 0)))

    # ---- fused pallas_call -------------------------------------------------------
    def build(single_buffer_consts):
        def const_spec(shape):
            if single_buffer_consts:
                return pl.BlockSpec(shape, lambda b: (0,) * len(shape),
                                    pipeline_mode=pl.Buffered(1))
            return pl.BlockSpec(shape, lambda b: (0,) * len(shape))

        return pl.pallas_call(
            _fused_kernel,
            out_shape=jax.ShapeDtypeStruct((Bp, Jp), f32),
            grid_spec=pltpu.PrefetchScalarGridSpec(
                num_scalar_prefetch=0,
                grid=(Bp // TB,),
                in_specs=[
                    pl.BlockSpec((PP, TB, CinK), lambda b: (0, b, 0)),
                    const_spec((PP, CinK, Cout)),
                    const_spec((1, Cout)),
                    const_spec((Pout, Cout, Jp)),
                    const_spec((1, Jp)),
                ],
                out_specs=pl.BlockSpec((TB, Jp), lambda b: (b, 0)),
            ),
            compiler_params=pltpu.CompilerParams(
                dimension_semantics=("parallel",),
                vmem_limit_bytes=vmem_limit),
        )

    try:
        out = build(True)(xcol, wcb, b1, v, b2)
    except Exception:
        # Older Pallas may reject Buffered(1); fall back to the default
        # double-buffered constants (identical semantics).
        out = build(False)(xcol, wcb, b1, v, b2)

    return out[:B, :Jout]


def _reference(x, conv_w, conv_b, fc_w, fc_b, P):
    """Pure-JAX reference matching the PyTorch forward semantics."""
    B, Cin, L = x.shape
    Cout, _, K = conv_w.shape
    Lout = L - K + 1
    windows = jnp.stack([x[:, :, k:k + Lout] for k in range(K)], axis=-1)
    y = jnp.einsum('bilk,oik->bol', windows, conv_w) + conv_b[None, :, None]
    y = jnp.maximum(y, 0.0)
    Pout = (Lout - P) // P + 1
    y = y[:, :, :Pout * P].reshape(B, Cout, Pout, P).max(-1)     # MaxPool1d
    flat = y.reshape(B, -1)                                      # x.view(B, -1)
    return flat @ fc_w.T + fc_b[None, :]


if __name__ == "__main__":
    # Module hyper-params (small, consistent with the PyTorch __init__):
    B, Cin, L = 2, 4, 16            # input: (batch, 4 channels, input_len=16)
    Cout, K = 8, 3                  # cnn_channel_num=8, cnn_kernel_len=3
    P = 2                           # pool_kernel_len=2 (stride defaults to kernel)
    Jout = 1                        # linear_out_len=1
    Lout = L - K + 1                # 14
    Pout = (Lout - P) // P + 1      # 7

    key = jax.random.PRNGKey(0)
    k1, k2, k3, k4, k5 = jax.random.split(key, 5)
    conv_w = 0.1 * jax.random.normal(k1, (Cout, Cin, K), jnp.float32)
    conv_b = 0.1 * jax.random.normal(k2, (Cout,), jnp.float32)
    fc_w = 0.1 * jax.random.normal(k3, (Jout, Cout * Pout), jnp.float32)
    fc_b = 0.1 * jax.random.normal(k4, (Jout,), jnp.float32)
    x = jax.random.normal(k5, (B, Cin, L), jnp.float32)

    ref = _reference(x, conv_w, conv_b, fc_w, fc_b, P)

    # Exact-semantics path (f32 MXU operands): tight tolerance.
    out_f32 = jax.block_until_ready(
        cnn1d_maxpool_linear(x, conv_w, conv_b, fc_w, fc_b, P,
                             compute_dtype=jnp.float32))
    assert out_f32.shape == (B, Jout)
    assert jnp.allclose(out_f32, ref, atol=1e-5, rtol=1e-5), (out_f32, ref)

    # Fast path (default: bf16 MXU operands, f32 accumulation): loose tolerance.
    out_bf16 = jax.block_until_ready(
        cnn1d_maxpool_linear(x, conv_w, conv_b, fc_w, fc_b, P))
    assert out_bf16.shape == (B, Jout)
    assert jnp.allclose(out_bf16, ref, atol=5e-2, rtol=5e-2), (out_bf16, ref)

    print("KERNEL_OK")
</pallas_src>

<mosaic_0001>
module attributes {stable_mosaic.version = 11 : i64} {
  func.func @_fused_kernel(%arg0: i32, %arg1: memref<14x8x12xf32, #tpu.memory_space<vmem>>, %arg2: memref<14x12x8xf32, #tpu.memory_space<vmem>>, %arg3: memref<1x8xf32, #tpu.memory_space<vmem>>, %arg4: memref<7x8x128xf32, #tpu.memory_space<vmem>>, %arg5: memref<1x128xf32, #tpu.memory_space<vmem>>, %arg6: memref<8x128xf32, #tpu.memory_space<vmem>>) attributes {dimension_semantics = [#tpu.dimension_semantics<parallel>], iteration_bounds = array<i64: 1>, scalar_prefetch = 0 : i64, scratch_operands = 0 : i64, tpu.core_type = #tpu.core_type<tc>, window_params = [{transform_indices = @transform_0, window_bounds = array<i64: 14, 8, 12>}, {pipeline_mode = #tpu.pipeline_mode<synchronous>, transform_indices = @transform_1, window_bounds = array<i64: 14, 12, 8>}, {pipeline_mode = #tpu.pipeline_mode<synchronous>, transform_indices = @transform_2, window_bounds = array<i64: 1, 8>}, {pipeline_mode = #tpu.pipeline_mode<synchronous>, transform_indices = @transform_3, window_bounds = array<i64: 7, 8, 128>}, {pipeline_mode = #tpu.pipeline_mode<synchronous>, transform_indices = @transform_4, window_bounds = array<i64: 1, 128>}, {transform_indices = @transform_5, window_bounds = array<i64: 8, 128>}]} {
    %c0 = arith.constant 0 : index
    %c0_0 = arith.constant 0 : index
    %c0_1 = arith.constant 0 : index
    %0 = vector.load %arg1[%c0, %c0_0, %c0_1] : memref<14x8x12xf32, #tpu.memory_space<vmem>>, vector<14x8x12xf32>
    %c0_2 = arith.constant 0 : index
    %c0_3 = arith.constant 0 : index
    %c0_4 = arith.constant 0 : index
    %1 = vector.load %arg2[%c0_2, %c0_3, %c0_4] : memref<14x12x8xf32, #tpu.memory_space<vmem>>, vector<14x12x8xf32>
    "tpu.trace_start"() <{level = 10 : i32, message = "gbf,gfc->gbc"}> : () -> ()
    %cst = arith.constant dense<0.000000e+00> : vector<14x8x8xf32>
    %2 = tpu.matmul %0, %1, %cst {dimension_numbers = #tpu.dot_dimension_numbers<[2], [1], [1], [2], [0, 0, 0, 1, 1, 2], [0], [0]>} : vector<14x8x12xf32>, vector<14x12x8xf32>, vector<14x8x8xf32> -> vector<14x8x8xf32>
    "tpu.trace_stop"() : () -> ()
    %c0_5 = arith.constant 0 : index
    %c0_6 = arith.constant 0 : index
    %3 = vector.load %arg3[%c0_5, %c0_6] : memref<1x8xf32, #tpu.memory_space<vmem>>, vector<1x8xf32>
    %4 = vector.shape_cast %3 : vector<1x8xf32> to vector<1x1x8xf32>
    %5 = vector.broadcast %4 : vector<1x1x8xf32> to vector<14x8x8xf32>
    %6 = arith.addf %2, %5 : vector<14x8x8xf32>
    %cst_7 = arith.constant 0.000000e+00 : f32
    %7 = vector.broadcast %cst_7 : f32 to vector<14x8x8xf32>
    %8 = arith.maximumf %6, %7 : vector<14x8x8xf32>
    %9 = vector.shape_cast %8 : vector<14x8x8xf32> to vector<2x7x8x8xf32>
    %cst_8 = arith.constant dense<0xFF800000> : vector<7x8x8xf32>
    %10 = vector.multi_reduction <maximumf>, %9, %cst_8 [0] : vector<2x7x8x8xf32> to vector<7x8x8xf32>
    %c0_9 = arith.constant 0 : index
    %c0_10 = arith.constant 0 : index
    %c0_11 = arith.constant 0 : index
    %11 = vector.load %arg4[%c0_9, %c0_10, %c0_11] : memref<7x8x128xf32, #tpu.memory_space<vmem>>, vector<7x8x128xf32>
    "tpu.trace_start"() <{level = 10 : i32, message = "jbc,jco->jbo"}> : () -> ()
    %cst_12 = arith.constant dense<0.000000e+00> : vector<7x8x128xf32>
    %12 = tpu.matmul %10, %11, %cst_12 {dimension_numbers = #tpu.dot_dimension_numbers<[2], [1], [1], [2], [0, 0, 0, 1, 1, 2], [0], [0]>} : vector<7x8x8xf32>, vector<7x8x128xf32>, vector<7x8x128xf32> -> vector<7x8x128xf32>
    "tpu.trace_stop"() : () -> ()
    %cst_13 = arith.constant dense<0.000000e+00> : vector<8x128xf32>
    %13 = vector.multi_reduction <add>, %12, %cst_13 [0] : vector<7x8x128xf32> to vector<8x128xf32>
    %c0_14 = arith.constant 0 : index
    %c0_15 = arith.constant 0 : index
    %14 = vector.load %arg5[%c0_14, %c0_15] : memref<1x128xf32, #tpu.memory_space<vmem>>, vector<1x128xf32>
    %15 = vector.broadcast %14 : vector<1x128xf32> to vector<8x128xf32>
    %16 = arith.addf %13, %15 : vector<8x128xf32>
    %c0_16 = arith.constant 0 : index
    %c0_17 = arith.constant 0 : index
    %17 = vector.load %arg6[%c0_16, %c0_17] : memref<8x128xf32, #tpu.memory_space<vmem>>, vector<8x128xf32>
    tpu.vector_store %arg6[%c0_16, %c0_17], %16 {strides = array<i32>} : memref<8x128xf32, #tpu.memory_space<vmem>>, vector<8x128xf32>,
    return
  }
  func.func @transform_0(%arg0: i32) -> (i32, i32, i32) {
    %c0_i32 = arith.constant 0 : i32
    %c0_i32_0 = arith.constant 0 : i32
    %c0_i32_1 = arith.constant 0 : i32
    return %c0_i32, %arg0, %c0_i32_0 : i32, i32, i32
  }
  func.func @transform_1(%arg0: i32) -> (i32, i32, i32) {
    %c0_i32 = arith.constant 0 : i32
    %c0_i32_0 = arith.constant 0 : i32
    %c0_i32_1 = arith.constant 0 : i32
    %c0_i32_2 = arith.constant 0 : i32
    return %c0_i32, %c0_i32_0, %c0_i32_1 : i32, i32, i32
  }
  func.func @transform_2(%arg0: i32) -> (i32, i32) {
    %c0_i32 = arith.constant 0 : i32
    %c0_i32_0 = arith.constant 0 : i32
    %c0_i32_1 = arith.constant 0 : i32
    return %c0_i32, %c0_i32_0 : i32, i32
  }
  func.func @transform_3(%arg0: i32) -> (i32, i32, i32) {
    %c0_i32 = arith.constant 0 : i32
    %c0_i32_0 = arith.constant 0 : i32
    %c0_i32_1 = arith.constant 0 : i32
    %c0_i32_2 = arith.constant 0 : i32
    return %c0_i32, %c0_i32_0, %c0_i32_1 : i32, i32, i32
  }
  func.func @transform_4(%arg0: i32) -> (i32, i32) {
    %c0_i32 = arith.constant 0 : i32
    %c0_i32_0 = arith.constant 0 : i32
    %c0_i32_1 = arith.constant 0 : i32
    return %c0_i32, %c0_i32_0 : i32, i32
  }
  func.func @transform_5(%arg0: i32) -> (i32, i32) {
    %c0_i32 = arith.constant 0 : i32
    %c0_i32_0 = arith.constant 0 : i32
    return %arg0, %c0_i32 : i32, i32
  }
}

module attributes {stable_mosaic.version = 11 : i64} {
  func.func @_fused_kernel(%arg0: i32, %arg1: memref<14x8x12xf32, #tpu.memory_space<vmem>>, %arg2: memref<14x12x8xf32, #tpu.memory_space<vmem>>, %arg3: memref<1x8xf32, #tpu.memory_space<vmem>>, %arg4: memref<7x8x128xf32, #tpu.memory_space<vmem>>, %arg5: memref<1x128xf32, #tpu.memory_space<vmem>>, %arg6: memref<8x128xf32, #tpu.memory_space<vmem>>) attributes {dimension_semantics = [#tpu.dimension_semantics<parallel>], iteration_bounds = array<i64: 1>, scalar_prefetch = 0 : i64, scratch_operands = 0 : i64, tpu.core_type = #tpu.core_type<tc>, window_params = [{transform_indices = @transform_0, window_bounds = array<i64: 14, 8, 12>}, {pipeline_mode = #tpu.pipeline_mode<synchronous>, transform_indices = @transform_1, window_bounds = array<i64: 14, 12, 8>}, {pipeline_mode = #tpu.pipeline_mode<synchronous>, transform_indices = @transform_2, window_bounds = array<i64: 1, 8>}, {pipeline_mode = #tpu.pipeline_mode<synchronous>, transform_indices = @transform_3, window_bounds = array<i64: 7, 8, 128>}, {pipeline_mode = #tpu.pipeline_mode<synchronous>, transform_indices = @transform_4, window_bounds = array<i64: 1, 128>}, {transform_indices = @transform_5, window_bounds = array<i64: 8, 128>}]} {
    %c0 = arith.constant 0 : index
    %c0_0 = arith.constant 0 : index
    %c0_1 = arith.constant 0 : index
    %0 = vector.load %arg1[%c0, %c0_0, %c0_1] : memref<14x8x12xf32, #tpu.memory_space<vmem>>, vector<14x8x12xf32>
    %c0_2 = arith.constant 0 : index
    %c0_3 = arith.constant 0 : index
    %c0_4 = arith.constant 0 : index
    %1 = vector.load %arg2[%c0_2, %c0_3, %c0_4] : memref<14x12x8xf32, #tpu.memory_space<vmem>>, vector<14x12x8xf32>
    "tpu.trace_start"() <{level = 10 : i32, message = "gbf,gfc->gbc"}> : () -> ()
    %cst = arith.constant dense<0.000000e+00> : vector<14x8x8xf32>
    %2 = tpu.matmul %0, %1, %cst {dimension_numbers = #tpu.dot_dimension_numbers<[2], [1], [1], [2], [0, 0, 0, 1, 1, 2], [0], [0]>} : vector<14x8x12xf32>, vector<14x12x8xf32>, vector<14x8x8xf32> -> vector<14x8x8xf32>
    "tpu.trace_stop"() : () -> ()
    %c0_5 = arith.constant 0 : index
    %c0_6 = arith.constant 0 : index
    %3 = vector.load %arg3[%c0_5, %c0_6] : memref<1x8xf32, #tpu.memory_space<vmem>>, vector<1x8xf32>
    %4 = vector.shape_cast %3 : vector<1x8xf32> to vector<1x1x8xf32>
    %5 = vector.broadcast %4 : vector<1x1x8xf32> to vector<14x8x8xf32>
    %6 = arith.addf %2, %5 : vector<14x8x8xf32>
    %cst_7 = arith.constant 0.000000e+00 : f32
    %7 = vector.broadcast %cst_7 : f32 to vector<14x8x8xf32>
    %8 = arith.maximumf %6, %7 : vector<14x8x8xf32>
    %9 = vector.shape_cast %8 : vector<14x8x8xf32> to vector<2x7x8x8xf32>
    %cst_8 = arith.constant dense<0xFF800000> : vector<7x8x8xf32>
    %10 = vector.multi_reduction <maximumf>, %9, %cst_8 [0] : vector<2x7x8x8xf32> to vector<7x8x8xf32>
    %c0_9 = arith.constant 0 : index
    %c0_10 = arith.constant 0 : index
    %c0_11 = arith.constant 0 : index
    %11 = vector.load %arg4[%c0_9, %c0_10, %c0_11] : memref<7x8x128xf32, #tpu.memory_space<vmem>>, vector<7x8x128xf32>
    "tpu.trace_start"() <{level = 10 : i32, message = "jbc,jco->jbo"}> : () -> ()
    %cst_12 = arith.constant dense<0.000000e+00> : vector<7x8x128xf32>
    %12 = tpu.matmul %10, %11, %cst_12 {dimension_numbers = #tpu.dot_dimension_numbers<[2], [1], [1], [2], [0, 0, 0, 1, 1, 2], [0], [0]>} : vector<7x8x8xf32>, vector<7x8x128xf32>, vector<7x8x128xf32> -> vector<7x8x128xf32>
    "tpu.trace_stop"() : () -> ()
    %cst_13 = arith.constant dense<0.000000e+00> : vector<8x128xf32>
    %13 = vector.multi_reduction <add>, %12, %cst_13 [0] : vector<7x8x128xf32> to vector<8x128xf32>
    %c0_14 = arith.constant 0 : index
    %c0_15 = arith.constant 0 : index
    %14 = vector.load %arg5[%c0_14, %c0_15] : memref<1x128xf32, #tpu.memory_space<vmem>>, vector<1x128xf32>
    %15 = vector.broadcast %14 : vector<1x128xf32> to vector<8x128xf32>
    %16 = arith.addf %13, %15 : vector<8x128xf32>
    %c0_16 = arith.constant 0 : index
    %c0_17 = arith.constant 0 : index
    %17 = vector.load %arg6[%c0_16, %c0_17] : memref<8x128xf32, #tpu.memory_space<vmem>>, vector<8x128xf32>
    tpu.vector_store %arg6[%c0_16, %c0_17], %16 {strides = array<i32>} : memref<8x128xf32, #tpu.memory_space<vmem>>, vector<8x128xf32>,
    return
  }
  func.func @transform_0(%arg0: i32) -> (i32, i32, i32) {
    %c0_i32 = arith.constant 0 : i32
    %c0_i32_0 = arith.constant 0 : i32
    %c0_i32_1 = arith.constant 0 : i32
    return %c0_i32, %arg0, %c0_i32_0 : i32, i32, i32
  }
  func.func @transform_1(%arg0: i32) -> (i32, i32, i32) {
    %c0_i32 = arith.constant 0 : i32
    %c0_i32_0 = arith.constant 0 : i32
    %c0_i32_1 = arith.constant 0 : i32
    %c0_i32_2 = arith.constant 0 : i32
    return %c0_i32, %c0_i32_0, %c0_i32_1 : i32, i32, i32
  }
  func.func @transform_2(%arg0: i32) -> (i32, i32) {
    %c0_i32 = arith.constant 0 : i32
    %c0_i32_0 = arith.constant 0 : i32
    %c0_i32_1 = arith.constant 0 : i32
    return %c0_i32, %c0_i32_0 : i32, i32
  }
  func.func @transform_3(%arg0: i32) -> (i32, i32, i32) {
    %c0_i32 = arith.constant 0 : i32
    %c0_i32_0 = arith.constant 0 : i32
    %c0_i32_1 = arith.constant 0 : i32
    %c0_i32_2 = arith.constant 0 : i32
    return %c0_i32, %c0_i32_0, %c0_i32_1 : i32, i32, i32
  }
  func.func @transform_4(%arg0: i32) -> (i32, i32) {
    %c0_i32 = arith.constant 0 : i32
    %c0_i32_0 = arith.constant 0 : i32
    %c0_i32_1 = arith.constant 0 : i32
    return %c0_i32, %c0_i32_0 : i32, i32
  }
  func.func @transform_5(%arg0: i32) -> (i32, i32) {
    %c0_i32 = arith.constant 0 : i32
    %c0_i32_0 = arith.constant 0 : i32
    return %arg0, %c0_i32 : i32, i32
  }
}

</mosaic_0001>

<bundles_post_ra>
// kernel: tpu_custom_call.1
= control target key start
LH: loop header
LB: loop body
LE: loop exit
PB: predicated region body
PF: predicated region fallthrough
CT: control target
= control target key end

     0   :  { %vm74_vm0 = vcmask 1043456   ;;  %v2030_v2 = vmov 0.0|0.0   ;;  %vm2031_vm1 = vmmov 1   ;;  %vm2032_vm3 = vmmov 0   ;;  %s2376_s0 = inlined_call_operand.vmem [shape: f32[14,8,12], index: 0, kind: input, shape index: {}]   ;;  %s2377_s1 = inlined_call_operand.vmem [shape: f32[14,12,8], index: 1, kind: input, shape index: {}]   ;;  %s2378_s2 = inlined_call_operand.vmem [shape: f32[1,8], index: 2, kind: input, shape index: {}]   ;;  %s2379_s3 = inlined_call_operand.vmem [shape: f32[7,8,128], index: 3, kind: input, shape index: {}]   ;;  %s2380_s4 = inlined_call_operand.vmem [shape: f32[1,128], index: 4, kind: input, shape index: {}]   ;;  %s2381_s5 = inlined_call_operand.hbm [shape: f32[8,128], index: 5, kind: output, shape index: {}]  }
   0x1   :  { %v35_v0 = vld [vmem:[%s2377_s1] sm:$0xff]  ;;  %v36_v1 = vld [vmem:[%s2377_s1 + $0x8] sm:$0xf]  ;;  %1945 = vmatprep.subr.bf16.mxu0 %v2030_v2  ;;  %1949 = vmatprep.subr.bf16.mxu1 %v2030_v2  ;;  %vm2073_vm2 = vmpackc.low %vm74_vm0, %vm2031_vm1  ;;  %v2033_v8 = vmov 0.0   ;;  %vm70_vm4 = vcmask 97280  }
   0x2   :  { %v1946_v3 = vpack.c.bf16 %v36_v1, %v35_v0  ;;  %v37_v5 = vld [vmem:[%s2377_s1 + $0x10] sm:$0xff]  ;;  %v38_v6 = vld [vmem:[%s2377_s1 + $0x18] sm:$0xf]  ;;  %1816 = vmatprep.mubr.msk.f32.mxu0 %vm2032_vm3, %v2033_v8  ;;  %1823 = vmatprep.mubr.msk.f32.mxu1 %vm2032_vm3, %v2033_v8  ;;  %v21_v9 = vld [vmem:[%s2376_s0] sm:$0xff] }
   0x3   :  { %v1950_v7 = vpack.c.bf16 %v38_v6, %v37_v5  ;;  %v39_v10 = vld [vmem:[%s2377_s1 + $0x20] sm:$0xff]  ;;  %v40_v11 = vld [vmem:[%s2377_s1 + $0x28] sm:$0xf]  ;;  %v41_v12 = vld [vmem:[%s2377_s1 + $0x30] sm:$0xff] }
   0x4   :  { %1948 = vmatpush3.bf16.msk.msra.mxu0 %vm2073_vm2, %v1946_v3  ;;  %v42_v13 = vld [vmem:[%s2377_s1 + $0x38] sm:$0xf]  ;;  %v22_v14 = vld [vmem:[%s2376_s0 + $0x8] sm:$0xff]  ;;  %v1954_v15 = vpack.c.bf16 %v40_v11, %v39_v10  ;;  %v43_v17 = vld [vmem:[%s2377_s1 + $0x40] sm:$0xff] }
   0x5   :  { %1952 = vmatpush3.bf16.msk.msra.mxu1 %vm2073_vm2, %v1950_v7  ;;  %1953 = vmatprep.subr.bf16.mxu0 %v2030_v2  ;;  %v1958_v16 = vpack.c.bf16 %v42_v13, %v41_v12  ;;  %v44_v18 = vld [vmem:[%s2377_s1 + $0x48] sm:$0xf]  ;;  %v45_v19 = vld [vmem:[%s2377_s1 + $0x50] sm:$0xff]  ;;  %v46_v20 = vld [vmem:[%s2377_s1 + $0x58] sm:$0xf] }
   0x6   :  { %1957 = vmatprep.subr.bf16.mxu1 %v2030_v2  ;;  %v23_v21 = vld [vmem:[%s2376_s0 + $0x10] sm:$0xff]  ;;  %v1962_v22 = vpack.c.bf16 %v44_v18, %v43_v17  ;;  %v24_v23 = vld [vmem:[%s2376_s0 + $0x18] sm:$0xff]  ;;  %v1966_v24 = vpack.c.bf16 %v46_v20, %v45_v19  ;;  %v47_v25 = vld [vmem:[%s2377_s1 + $0x60] sm:$0xff] }
   0x7   :  { %1817 = vmatmul.mubr.msk.f32.vlgmr.msra.gmra.mrb[0].mxu0 %vm70_vm4, %v21_v9  ;;  %v48_v26 = vld [vmem:[%s2377_s1 + $0x68] sm:$0xf]  ;;  %v49_v27 = vld [vmem:[%s2377_s1 + $0x70] sm:$0xff]  ;;  %v50_v28 = vld [vmem:[%s2377_s1 + $0x78] sm:$0xf] }
   0x8   :  { %1824 = vmatmul.mubr.msk.f32.vlgmr.msra.gmra.mrb[0].mxu1 %vm70_vm4, %v22_v14  ;;  %1956 = vmatpush3.bf16.msk.msra.mxu0 %vm2073_vm2, %v1954_v15  ;;  %v25_v29 = vld [vmem:[%s2376_s0 + $0x20] sm:$0xff]  ;;  %v1970_v30 = vpack.c.bf16 %v48_v26, %v47_v25  ;;  %v26_v31 = vld [vmem:[%s2376_s0 + $0x28] sm:$0xff]  ;;  %v1974_v32 = vpack.c.bf16 %v50_v28, %v49_v27  ;;  %v53_v35 = vld [vmem:[%s2377_s1 + $0x90] sm:$0xff] }
   0x9   :  { %1960 = vmatpush3.bf16.msk.msra.mxu1 %vm2073_vm2, %v1958_v16  ;;  %1830 = vmatprep.mubr.msk.f32.mxu0 %vm2032_vm3, %v2033_v8  ;;  %v51_v33 = vld [vmem:[%s2377_s1 + $0x80] sm:$0xff]  ;;  %v52_v34 = vld [vmem:[%s2377_s1 + $0x88] sm:$0xf]  ;;  %v54_v36 = vld [vmem:[%s2377_s1 + $0x98] sm:$0xf] }
   0xa   :  { %1837 = vmatprep.mubr.msk.f32.mxu1 %vm2032_vm3, %v2033_v8  ;;  %1961 = vmatprep.subr.bf16.mxu0 %v2030_v2  ;;  %v27_v37 = vld [vmem:[%s2376_s0 + $0x30] sm:$0xff]  ;;  %v1978_v38 = vpack.c.bf16 %v52_v34, %v51_v33 }
   0xb   :  { %1831 = vmatmul.mubr.msk.f32.vlgmr.msra.gmra.mrb[2].mxu0 %vm70_vm4, %v23_v21  ;;  %1965 = vmatprep.subr.bf16.mxu1 %v2030_v2 }
   0xc   :  { %1838 = vmatmul.mubr.msk.f32.vlgmr.msra.gmra.mrb[2].mxu1 %vm70_vm4, %v24_v23  ;;  %1964 = vmatpush3.bf16.msk.msra.mxu0 %vm2073_vm2, %v1962_v22 }
   0xd   :  { %1968 = vmatpush3.bf16.msk.msra.mxu1 %vm2073_vm2, %v1966_v24  ;;  %1844 = vmatprep.mubr.msk.f32.mxu0 %vm2032_vm3, %v2033_v8 }
   0xe   :  { %1851 = vmatprep.mubr.msk.f32.mxu1 %vm2032_vm3, %v2033_v8  ;;  %1969 = vmatprep.subr.bf16.mxu0 %v2030_v2 }
   0xf   :  { %1845 = vmatmul.mubr.msk.f32.vlgmr.msra.gmra.mrb[4].mxu0 %vm70_vm4, %v25_v29  ;;  %1973 = vmatprep.subr.bf16.mxu1 %v2030_v2 }
  0x10   :  { %1852 = vmatmul.mubr.msk.f32.vlgmr.msra.gmra.mrb[4].mxu1 %vm70_vm4, %v26_v31  ;;  %1972 = vmatpush3.bf16.msk.msra.mxu0 %vm2073_vm2, %v1970_v30 }
  0x11   :  { %10 = vsyncpa [#allocation3], 0  ;;  %1976 = vmatpush3.bf16.msk.msra.mxu1 %vm2073_vm2, %v1974_v32  ;;  %1858 = vmatprep.mubr.msk.f32.mxu0 %vm2032_vm3, %v2033_v8  ;;  %v28_v39 = vld [vmem:[%s2376_s0 + $0x38] sm:$0xff]  ;;  %v1982_v40 = vpack.c.bf16 %v54_v36, %v53_v35  ;;  %v55_v41 = vld [vmem:[%s2377_s1 + $0xa0] sm:$0xff]  ;;  %vm1150_vm5 = vcmask 64512   ;;  %s2034_s16 = smov [#allocation2]  }
  0x12   :  { %v56_v42 = vld [vmem:[%s2377_s1 + $0xa8] sm:$0xf]  ;;  %1865 = vmatprep.mubr.msk.f32.mxu1 %vm2032_vm3, %v2033_v8  ;;  %1977 = vmatprep.subr.bf16.mxu0 %v2030_v2  ;;  %v57_v43 = vld [vmem:[%s2377_s1 + $0xb0] sm:$0xff]  ;;  %v58_v44 = vld [vmem:[%s2377_s1 + $0xb8] sm:$0xf]  ;;  %s1711_s17 = sshll.u32 %s2034_s16, 4  ;;  %s1712_s17 = int_to_ptr.vmem [resolvable:$true] %s1711_s17 }
  0x13   :  { %1859 = vmatmul.mubr.msk.f32.vlgmr.msra.gmra.mrb[6].mxu0 %vm70_vm4, %v27_v37  ;;  %1981 = vmatprep.subr.bf16.mxu1 %v2030_v2  ;;  %v29_v45 = vld [vmem:[%s2376_s0 + $0x40] sm:$0xff]  ;;  %v1986_v46 = vpack.c.bf16 %v56_v42, %v55_v41  ;;  %v30_v47 = vld [vmem:[%s2376_s0 + $0x48] sm:$0xff]  ;;  %v1990_v48 = vpack.c.bf16 %v58_v44, %v57_v43  ;;  %v61_v51 = vld [vmem:[%s2377_s1 + $0xd0] sm:$0xff]  ;;  %s2006_s18 = scalar_lea.vmem %s1712_s17, 128  ;;  %p2011_p1 = scmp.lt.s32.totalorder %s1712_s17, %s1712_s17 }
  0x14   :  { %1866 = vmatmul.mubr.msk.f32.vlgmr.msra.gmra.mrb[6].mxu1 %vm70_vm4, %v28_v39  ;;  %1980 = vmatpush3.bf16.msk.msra.mxu0 %vm2073_vm2, %v1978_v38  ;;  %v59_v49 = vld [vmem:[%s2377_s1 + $0xc0] sm:$0xff]  ;;  %v60_v50 = vld [vmem:[%s2377_s1 + $0xc8] sm:$0xf]  ;;  %v62_v52 = vld [vmem:[%s2377_s1 + $0xd8] sm:$0xf]  ;;  %p2007_p0 = scmp.ne.s32.totalorder %s1712_s17, %s2006_s18  ;;  %p2012_p2 = scmp.lt.s32.totalorder %s2006_s18, %s2006_s18 }
  0x15   :  { %1984 = vmatpush3.bf16.msk.msra.mxu1 %vm2073_vm2, %v1982_v40  ;;  %1872 = vmatprep.mubr.msk.f32.mxu0 %vm2032_vm3, %v2033_v8  ;;  %v31_v53 = vld [vmem:[%s2376_s0 + $0x50] sm:$0xff]  ;;  %v1994_v54 = vpack.c.bf16 %v60_v50, %v59_v49  ;;  %v32_v55 = vld [vmem:[%s2376_s0 + $0x58] sm:$0xff]  ;;  %v1998_v56 = vpack.c.bf16 %v62_v52, %v61_v51  ;;  %v33_v57 = vld [vmem:[%s2376_s0 + $0x60] sm:$0xff] }
  0x16   :  { %1879 = vmatprep.mubr.msk.f32.mxu1 %vm2032_vm3, %v2033_v8  ;;  %1985 = vmatprep.subr.bf16.mxu0 %v2030_v2  ;;  %v34_v58 = vld [vmem:[%s2376_s0 + $0x68] sm:$0xff]  ;;  %v1172_v59 = vld [vmem:[%s2379_s3] sm:$0xff]  ;;  %v1174_v35 = vld [vmem:[%s2379_s3 + $0x10] sm:$0xff]  ;;  %p2013_p3 = por %p2012_p2, %p2011_p1 }
  0x17   :  { %1873 = vmatmul.mubr.msk.f32.vlgmr.msra.gmra.mrb[8].mxu0 %vm70_vm4, %v29_v45  ;;  %1989 = vmatprep.subr.bf16.mxu1 %v2030_v2  ;;  %v1173_v60 = vld [vmem:[%s2379_s3 + $0x8] sm:$0xff]  ;;  %v2296_v5 = vld [vmem:[%s2378_s2] ss:$0 sm:$0xff]  ;;  %v1175_v52 = vld [vmem:[%s2379_s3 + $0x18] sm:$0xff] }
  0x18   :  { %1880 = vmatmul.mubr.msk.f32.vlgmr.msra.gmra.mrb[8].mxu1 %vm70_vm4, %v30_v47  ;;  %1988 = vmatpush3.bf16.msk.msra.mxu0 %vm2073_vm2, %v1986_v46  ;;  %p2014_p4 = pnand %p2013_p3, %p2007_p0 }
  0x19   :  { %1992 = vmatpush3.bf16.msk.msra.mxu1 %vm2073_vm2, %v1990_v48  ;;  %1886 = vmatprep.mubr.msk.f32.mxu0 %vm2032_vm3, %v2033_v8 }
  0x1a   :  { %1893 = vmatprep.mubr.msk.f32.mxu1 %vm2032_vm3, %v2033_v8  ;;  %1993 = vmatprep.subr.bf16.mxu0 %v2030_v2 }
  0x1b   :  { %1887 = vmatmul.mubr.msk.f32.vlgmr.msra.gmra.mrb[10].mxu0 %vm70_vm4, %v31_v53  ;;  %1997 = vmatprep.subr.bf16.mxu1 %v2030_v2 }
  0x1c   :  { %1894 = vmatmul.mubr.msk.f32.vlgmr.msra.gmra.mrb[10].mxu1 %vm70_vm4, %v32_v55  ;;  %1996 = vmatpush3.bf16.msk.msra.mxu0 %vm2073_vm2, %v1994_v54  ;;  %v1176_v55 = vld [vmem:[%s2379_s3 + $0x20] sm:$0xff] }
  0x1d   :  { %2000 = vmatpush3.bf16.msk.msra.mxu1 %vm2073_vm2, %v1998_v56  ;;  %1900 = vmatprep.mubr.msk.f32.mxu0 %vm2032_vm3, %v2033_v8 }
  0x1e   :  { %1907 = vmatprep.mubr.msk.f32.mxu1 %vm2032_vm3, %v2033_v8  ;;  %1910 = vmatprep.subr.mxu0 %v2033_v8 }
  0x1f   :  { %1901 = vmatmul.mubr.msk.f32.vlgmr.msra.gmra.mrb[12].mxu0 %vm70_vm4, %v33_v57  ;;  %1915 = vmatprep.subr.mxu1 %v2033_v8 }
  0x20   :  { %1908 = vmatmul.mubr.msk.f32.vlgmr.msra.gmra.mrb[12].mxu1 %vm70_vm4, %v34_v58  ;;  %1912 = vmatprep.mubr.msk.f32.mxu0 %vm2032_vm3, %v2033_v8 }
  0x21   :  { %1917 = vmatprep.mubr.msk.f32.mxu1 %vm2032_vm3, %v2033_v8  ;;  %1911 = vmatpush3.msra.mxu0 %v1172_v59 }
  0x22   :  { %1920 = vmatprep.subr.mxu0 %v2033_v8  ;;  %1916 = vmatpush3.msra.mxu1 %v1173_v60 }
  0x23   :  { %1925 = vmatprep.subr.mxu1 %v2033_v8 }
  0xda   :  { %v144_v61 = vpop.f32.mrb[0].mxu0 }
  0xdb   :  { %v1818_v62 = vpop.f32.mrb[1].mxu0  ;;  %v220_v63 = vpop.f32.mrb[0].mxu1  ;;  %v145_v10 = vadd.f32 %v2296_v5, %v144_v61 }
  0xdc   :  { %v1825_v0 = vpop.f32.mrb[1].mxu1  ;;  %v221_v12 = vadd.f32 %v2296_v5, %v220_v63 }
  0xdd   :  { %v1136_v17 = vmax.f32 %v145_v10, 0.0 }
  0xde   :  { %v296_v1 = vpop.f32.mrb[2].mxu0  ;;  %v1137_v20 = vmax.f32 %v221_v12, 0.0 }
  0xdf   :  { %v1832_v2 = vpop.f32.mrb[3].mxu0  ;;  %v372_v3 = vpop.f32.mrb[2].mxu1  ;;  %v297_v13 = vadd.f32 %v2296_v5, %v296_v1  ;;  %v1151_v29 = vsel %vm1150_vm5, %v1136_v17, -inf }
  0xe0   :  { %v1839_v4 = vpop.f32.mrb[3].mxu1  ;;  %v373_v22 = vadd.f32 %v2296_v5, %v372_v3  ;;  %v1154_v36 = vsel %vm1150_vm5, %v1137_v20, -inf }
  0xe1   :  { %v1138_v21 = vmax.f32 %v297_v13, 0.0 }
  0xe2   :  { %v448_v6 = vpop.f32.mrb[4].mxu0  ;;  %v1139_v38 = vmax.f32 %v373_v22, 0.0 }
  0xe3   :  { %v1846_v7 = vpop.f32.mrb[5].mxu0  ;;  %v524_v9 = vpop.f32.mrb[4].mxu1  ;;  %v449_v25 = vadd.f32 %v2296_v5, %v448_v6  ;;  %v1157_v37 = vsel %vm1150_vm5, %v1138_v21, -inf }
  0xe4   :  { %v1853_v11 = vpop.f32.mrb[5].mxu1  ;;  %v525_v42 = vadd.f32 %v2296_v5, %v524_v9  ;;  %v1160_v56 = vsel %vm1150_vm5, %v1139_v38, -inf  ;;  %v1177_v7 = vld [vmem:[%s2379_s3 + $0x28] sm:$0xff] }
  0xe5   :  { %v1140_v41 = vmax.f32 %v449_v25, 0.0 }
  0xe6   :  { %v600_v14 = vpop.f32.mrb[6].mxu0  ;;  %v1141_v60 = vmax.f32 %v525_v42, 0.0 }
  0xe7   :  { %v676_v15 = vpop.f32.mrb[6].mxu1  ;;  %v1860_v16 = vpop.f32.mrb[7].mxu0  ;;  %v601_v47 = vadd.f32 %v2296_v5, %v600_v14  ;;  %v1163_v59 = vsel %vm1150_vm5, %v1140_v41, -inf }
  0xe8   :  { %v677_v18 = vadd.f32 %v2296_v5, %v676_v15  ;;  %v1867_v19 = vpop.f32.mrb[7].mxu1  ;;  %v1166_v12 = vsel %vm1150_vm5, %v1141_v60, -inf }
  0xe9   :  { %v1142_v1 = vmax.f32 %v601_v47, 0.0 }
  0xea   :  { %v1143_v23 = vmax.f32 %v677_v18, 0.0  ;;  %v752_v24 = vpop.f32.mrb[8].mxu0 }
  0xeb   :  { %v753_v26 = vadd.f32 %v2296_v5, %v752_v24  ;;  %v828_v27 = vpop.f32.mrb[8].mxu1  ;;  %v1874_v28 = vpop.f32.mrb[9].mxu0  ;;  %v1169_v14 = vsel %vm1150_vm5, %v1142_v1, -inf }
  0xec   :  { %v1152_v30 = vsel %vm1150_vm5, %v1143_v23, -inf  ;;  %v829_v31 = vadd.f32 %v2296_v5, %v828_v27  ;;  %v1881_v32 = vpop.f32.mrb[9].mxu1 }
  0xed   :  { %v1153_v33 = vmax.f32 %v1151_v29, %v1152_v30  ;;  %v1144_v34 = vmax.f32 %v753_v26, 0.0 }
  0xee   :  { %v1145_v39 = vmax.f32 %v829_v31, 0.0  ;;  %v904_v40 = vpop.f32.mrb[10].mxu0 }
  0xef   :  { %v1155_v43 = vsel %vm1150_vm5, %v1144_v34, -inf  ;;  %v905_v44 = vadd.f32 %v2296_v5, %v904_v40  ;;  %v980_v45 = vpop.f32.mrb[10].mxu1  ;;  %1913 = vmatmul.mubr.msk.f32.vlgmr.msra.gmra.mrb[14].mxu0 %vm1150_vm5, %v1153_v33  ;;  %v1888_v46 = vpop.f32.mrb[11].mxu0 }
  0xf0   :  { %v1156_v48 = vmax.f32 %v1154_v36, %v1155_v43  ;;  %v1158_v49 = vsel %vm1150_vm5, %v1145_v39, -inf  ;;  %v981_v50 = vadd.f32 %v2296_v5, %v980_v45  ;;  %v1895_v51 = vpop.f32.mrb[11].mxu1  ;;  %1921 = vmatpush3.msra.mxu0 %v1174_v35  ;;  %1922 = vmatprep.mubr.msk.f32.mxu0 %vm2032_vm3, %v2033_v8  ;;  %v1755_v36 = vld [vmem:[%s2380_s4] ss:$0 sm:$0xff] }
  0xf1   :  { %v1159_v53 = vmax.f32 %v1157_v37, %v1158_v49  ;;  %v1146_v54 = vmax.f32 %v905_v44, 0.0  ;;  %1930 = vmatprep.subr.mxu0 %v2033_v8 }
  0xf2   :  { %v1147_v57 = vmax.f32 %v981_v50, 0.0  ;;  %v1056_v58 = vpop.f32.mrb[12].mxu0  ;;  %1918 = vmatmul.mubr.msk.f32.vlgmr.msra.gmra.mrb[14].mxu1 %vm1150_vm5, %v1156_v48 }
  0xf3   :  { %v1161_v61 = vsel %vm1150_vm5, %v1146_v54, -inf  ;;  %v1057_v62 = vadd.f32 %v2296_v5, %v1056_v58  ;;  %v1132_v63 = vpop.f32.mrb[12].mxu1  ;;  %1923 = vmatmul.mubr.msk.f32.vlgmr.msra.gmra.mrb[16].mxu0 %vm1150_vm5, %v1159_v53  ;;  %v1902_v0 = vpop.f32.mrb[13].mxu0  ;;  %1926 = vmatpush3.msra.mxu1 %v1175_v52 }
  0xf4   :  { %v1162_v2 = vmax.f32 %v1160_v56, %v1161_v61  ;;  %v1164_v3 = vsel %vm1150_vm5, %v1147_v57, -inf  ;;  %v1133_v4 = vadd.f32 %v2296_v5, %v1132_v63  ;;  %v1909_v6 = vpop.f32.mrb[13].mxu1  ;;  %1927 = vmatprep.mubr.msk.f32.mxu1 %vm2032_vm3, %v2033_v8  ;;  %1931 = vmatpush3.msra.mxu0 %v1176_v55  ;;  %v1178_v5 = vld [vmem:[%s2379_s3 + $0x30] sm:$0xff] }
  0xf5   :  { %v1165_v9 = vmax.f32 %v1163_v59, %v1164_v3  ;;  %v1148_v10 = vmax.f32 %v1057_v62, 0.0  ;;  %1932 = vmatprep.mubr.msk.f32.mxu0 %vm2032_vm3, %v2033_v8  ;;  %1935 = vmatprep.subr.mxu1 %v2033_v8 }
  0xf6   :  { %v1149_v11 = vmax.f32 %v1133_v4, 0.0  ;;  %1928 = vmatmul.mubr.msk.f32.vlgmr.msra.gmra.mrb[16].mxu1 %vm1150_vm5, %v1162_v2  ;;  %1940 = vmatprep.subr.mxu0 %v2033_v8 }
  0xf7   :  { %v1167_v13 = vsel %vm1150_vm5, %v1148_v10, -inf  ;;  %1933 = vmatmul.mubr.msk.f32.vlgmr.msra.gmra.mrb[18].mxu0 %vm1150_vm5, %v1165_v9  ;;  %1936 = vmatpush3.msra.mxu1 %v1177_v7 }
  0xf8   :  { %v1168_v15 = vmax.f32 %v1166_v12, %v1167_v13  ;;  %v1170_v16 = vsel %vm1150_vm5, %v1149_v11, -inf  ;;  %1937 = vmatprep.mubr.msk.f32.mxu1 %vm2032_vm3, %v2033_v8  ;;  %1941 = vmatpush3.msra.mxu0 %v1178_v5 }
  0xf9   :  { %v1171_v17 = vmax.f32 %v1169_v14, %v1170_v16  ;;  %1942 = vmatprep.mubr.msk.f32.mxu0 %vm2032_vm3, %v2033_v8 }
  0xfa   :  { %1938 = vmatmul.mubr.msk.f32.vlgmr.msra.gmra.mrb[18].mxu1 %vm1150_vm5, %v1168_v15 }
  0xfb   :  { %1943 = vmatmul.mubr.msk.f32.vlgmr.msra.gmra.mrb[20].mxu0 %vm1150_vm5, %v1171_v17 }
 0x1c2   :  { %v1248_v18 = vpop.f32.mrb[14].mxu0 }
 0x1c3   :  { %v1914_v19 = vpop.f32.mrb[15].mxu0 }
 0x1c5   :  { %v1321_v20 = vpop.f32.mrb[14].mxu1 }
 0x1c6   :  { %v1690_v21 = vadd.f32 %v1321_v20, %v1248_v18  ;;  %v1394_v22 = vpop.f32.mrb[16].mxu0  ;;  %v1919_v23 = vpop.f32.mrb[15].mxu1 }
 0x1c7   :  { %v1924_v24 = vpop.f32.mrb[17].mxu0 }
 0x1c8   :  { %v1691_v25 = vadd.f32 %v1690_v21, %v1394_v22 }
 0x1c9   :  { %v1467_v26 = vpop.f32.mrb[16].mxu1 }
 0x1ca   :  { %v1692_v27 = vadd.f32 %v1691_v25, %v1467_v26  ;;  %v1540_v28 = vpop.f32.mrb[18].mxu0  ;;  %v1929_v29 = vpop.f32.mrb[17].mxu1 }
 0x1cb   :  { %v1934_v30 = vpop.f32.mrb[19].mxu0 }
 0x1cc   :  { %v1693_v31 = vadd.f32 %v1692_v27, %v1540_v28 }
 0x1cd   :  { %v1613_v32 = vpop.f32.mrb[18].mxu1 }
 0x1ce   :  { %v1694_v8 = vadd.f32 %v1693_v31, %v1613_v32  ;;  %v1686_v33 = vpop.f32.mrb[20].mxu0  ;;  %v1939_v34 = vpop.f32.mrb[19].mxu1 }
 0x1cf   :  { %v1944_v35 = vpop.f32.mrb[21].mxu0 }
 0x1d0   :  { %v1695_v37 = vadd.f32 %v1694_v8, %v1686_v33 }
 0x1d2   :  { %v1703_v38 = vadd.f32 %v1755_v36, %v1695_v37 }
 0x1d4   :  { %1704 = vst [vmem:[#allocation2] sm:$0xff] %v1703_v38 }
 0x1d5   :  { %2017 = shalt.err (!%p2014_p4)
}
 0x1d6   :  { %s2018_s1 = scalar_lea.hbm %s2381_s5, 128 }
 0x1d7   :  { %p2019_p5 = scmp.ne.s32.totalorder %s2381_s5, %s2018_s1  ;;  %p2022_p6 = scmp.lt.u32.totalorder %s2018_s1, %s2381_s5 }
 0x1d9   :  { %p2024_p7 = pnand %p2022_p6, %p2019_p5 }
 0x1db   :  { %2027 = shalt.err (!%p2024_p7)
}
 0x1dc   :  { %1714 = dma.vmem_to_hbm [thread:$0]  %s1712_s17, 128, %s2381_s5, [#allocation3]  }
 0x1dd   :  { %2028 = dma.done.wait [#allocation3], 128  }
 0x1de   :  { %2029 = vsyncadd [#allocation3], 4294967168 }
 0x1df   :  { %1718 = vsyncpa [#allocation3], 1 }

// kernel: tpu_custom_call.1
= control target key start
LH: loop header
LB: loop body
LE: loop exit
PB: predicated region body
PF: predicated region fallthrough
CT: control target
= control target key end

     0   :  { %vm74_vm0 = vcmask 1043456   ;;  %v2030_v2 = vmov 0.0|0.0   ;;  %vm2031_vm1 = vmmov 1   ;;  %vm2032_vm3 = vmmov 0   ;;  %s2376_s0 = inlined_call_operand.vmem [shape: f32[14,8,12], index: 0, kind: input, shape index: {}]   ;;  %s2377_s1 = inlined_call_operand.vmem [shape: f32[14,12,8], index: 1, kind: input, shape index: {}]   ;;  %s2378_s2 = inlined_call_operand.vmem [shape: f32[1,8], index: 2, kind: input, shape index: {}]   ;;  %s2379_s3 = inlined_call_operand.vmem [shape: f32[7,8,128], index: 3, kind: input, shape index: {}]   ;;  %s2380_s4 = inlined_call_operand.vmem [shape: f32[1,128], index: 4, kind: input, shape index: {}]   ;;  %s2381_s5 = inlined_call_operand.hbm [shape: f32[8,128], index: 5, kind: output, shape index: {}]  }
   0x1   :  { %v35_v0 = vld [vmem:[%s2377_s1] sm:$0xff]  ;;  %v36_v1 = vld [vmem:[%s2377_s1 + $0x8] sm:$0xf]  ;;  %1945 = vmatprep.subr.bf16.mxu0 %v2030_v2  ;;  %1949 = vmatprep.subr.bf16.mxu1 %v2030_v2  ;;  %vm2073_vm2 = vmpackc.low %vm74_vm0, %vm2031_vm1  ;;  %v2033_v8 = vmov 0.0   ;;  %vm70_vm4 = vcmask 97280  }
   0x2   :  { %v1946_v3 = vpack.c.bf16 %v36_v1, %v35_v0  ;;  %v37_v5 = vld [vmem:[%s2377_s1 + $0x10] sm:$0xff]  ;;  %v38_v6 = vld [vmem:[%s2377_s1 + $0x18] sm:$0xf]  ;;  %1816 = vmatprep.mubr.msk.f32.mxu0 %vm2032_vm3, %v2033_v8  ;;  %1823 = vmatprep.mubr.msk.f32.mxu1 %vm2032_vm3, %v2033_v8  ;;  %v21_v9 = vld [vmem:[%s2376_s0] sm:$0xff] }
   0x3   :  { %v1950_v7 = vpack.c.bf16 %v38_v6, %v37_v5  ;;  %v39_v10 = vld [vmem:[%s2377_s1 + $0x20] sm:$0xff]  ;;  %v40_v11 = vld [vmem:[%s2377_s1 + $0x28] sm:$0xf]  ;;  %v41_v12 = vld [vmem:[%s2377_s1 + $0x30] sm:$0xff] }
   0x4   :  { %1948 = vmatpush3.bf16.msk.msra.mxu0 %vm2073_vm2, %v1946_v3  ;;  %v42_v13 = vld [vmem:[%s2377_s1 + $0x38] sm:$0xf]  ;;  %v22_v14 = vld [vmem:[%s2376_s0 + $0x8] sm:$0xff]  ;;  %v1954_v15 = vpack.c.bf16 %v40_v11, %v39_v10  ;;  %v43_v17 = vld [vmem:[%s2377_s1 + $0x40] sm:$0xff] }
   0x5   :  { %1952 = vmatpush3.bf16.msk.msra.mxu1 %vm2073_vm2, %v1950_v7  ;;  %1953 = vmatprep.subr.bf16.mxu0 %v2030_v2  ;;  %v1958_v16 = vpack.c.bf16 %v42_v13, %v41_v12  ;;  %v44_v18 = vld [vmem:[%s2377_s1 + $0x48] sm:$0xf]  ;;  %v45_v19 = vld [vmem:[%s2377_s1 + $0x50] sm:$0xff]  ;;  %v46_v20 = vld [vmem:[%s2377_s1 + $0x58] sm:$0xf] }
   0x6   :  { %1957 = vmatprep.subr.bf16.mxu1 %v2030_v2  ;;  %v23_v21 = vld [vmem:[%s2376_s0 + $0x10] sm:$0xff]  ;;  %v1962_v22 = vpack.c.bf16 %v44_v18, %v43_v17  ;;  %v24_v23 = vld [vmem:[%s2376_s0 + $0x18] sm:$0xff]  ;;  %v1966_v24 = vpack.c.bf16 %v46_v20, %v45_v19  ;;  %v47_v25 = vld [vmem:[%s2377_s1 + $0x60] sm:$0xff] }
   0x7   :  { %1817 = vmatmul.mubr.msk.f32.vlgmr.msra.gmra.mrb[0].mxu0 %vm70_vm4, %v21_v9  ;;  %v48_v26 = vld [vmem:[%s2377_s1 + $0x68] sm:$0xf]  ;;  %v49_v27 = vld [vmem:[%s2377_s1 + $0x70] sm:$0xff]  ;;  %v50_v28 = vld [vmem:[%s2377_s1 + $0x78] sm:$0xf] }
   0x8   :  { %1824 = vmatmul.mubr.msk.f32.vlgmr.msra.gmra.mrb[0].mxu1 %vm70_vm4, %v22_v14  ;;  %1956 = vmatpush3.bf16.msk.msra.mxu0 %vm2073_vm2, %v1954_v15  ;;  %v25_v29 = vld [vmem:[%s2376_s0 + $0x20] sm:$0xff]  ;;  %v1970_v30 = vpack.c.bf16 %v48_v26, %v47_v25  ;;  %v26_v31 = vld [vmem:[%s2376_s0 + $0x28] sm:$0xff]  ;;  %v1974_v32 = vpack.c.bf16 %v50_v28, %v49_v27  ;;  %v53_v35 = vld [vmem:[%s2377_s1 + $0x90] sm:$0xff] }
   0x9   :  { %1960 = vmatpush3.bf16.msk.msra.mxu1 %vm2073_vm2, %v1958_v16  ;;  %1830 = vmatprep.mubr.msk.f32.mxu0 %vm2032_vm3, %v2033_v8  ;;  %v51_v33 = vld [vmem:[%s2377_s1 + $0x80] sm:$0xff]  ;;  %v52_v34 = vld [vmem:[%s2377_s1 + $0x88] sm:$0xf]  ;;  %v54_v36 = vld [vmem:[%s2377_s1 + $0x98] sm:$0xf] }
   0xa   :  { %1837 = vmatprep.mubr.msk.f32.mxu1 %vm2032_vm3, %v2033_v8  ;;  %1961 = vmatprep.subr.bf16.mxu0 %v2030_v2  ;;  %v27_v37 = vld [vmem:[%s2376_s0 + $0x30] sm:$0xff]  ;;  %v1978_v38 = vpack.c.bf16 %v52_v34, %v51_v33 }
   0xb   :  { %1831 = vmatmul.mubr.msk.f32.vlgmr.msra.gmra.mrb[2].mxu0 %vm70_vm4, %v23_v21  ;;  %1965 = vmatprep.subr.bf16.mxu1 %v2030_v2 }
   0xc   :  { %1838 = vmatmul.mubr.msk.f32.vlgmr.msra.gmra.mrb[2].mxu1 %vm70_vm4, %v24_v23  ;;  %1964 = vmatpush3.bf16.msk.msra.mxu0 %vm2073_vm2, %v1962_v22 }
   0xd   :  { %1968 = vmatpush3.bf16.msk.msra.mxu1 %vm2073_vm2, %v1966_v24  ;;  %1844 = vmatprep.mubr.msk.f32.mxu0 %vm2032_vm3, %v2033_v8 }
   0xe   :  { %1851 = vmatprep.mubr.msk.f32.mxu1 %vm2032_vm3, %v2033_v8  ;;  %1969 = vmatprep.subr.bf16.mxu0 %v2030_v2 }
   0xf   :  { %1845 = vmatmul.mubr.msk.f32.vlgmr.msra.gmra.mrb[4].mxu0 %vm70_vm4, %v25_v29  ;;  %1973 = vmatprep.subr.bf16.mxu1 %v2030_v2 }
  0x10   :  { %1852 = vmatmul.mubr.msk.f32.vlgmr.msra.gmra.mrb[4].mxu1 %vm70_vm4, %v26_v31  ;;  %1972 = vmatpush3.bf16.msk.msra.mxu0 %vm2073_vm2, %v1970_v30 }
  0x11   :  { %10 = vsyncpa [#allocation3], 0  ;;  %1976 = vmatpush3.bf16.msk.msra.mxu1 %vm2073_vm2, %v1974_v32  ;;  %1858 = vmatprep.mubr.msk.f32.mxu0 %vm2032_vm3, %v2033_v8  ;;  %v28_v39 = vld [vmem:[%s2376_s0 + $0x38] sm:$0xff]  ;;  %v1982_v40 = vpack.c.bf16 %v54_v36, %v53_v35  ;;  %v55_v41 = vld [vmem:[%s2377_s1 + $0xa0] sm:$0xff]  ;;  %vm1150_vm5 = vcmask 64512   ;;  %s2034_s16 = smov [#allocation2]  }
  0x12   :  { %v56_v42 = vld [vmem:[%s2377_s1 + $0xa8] sm:$0xf]  ;;  %1865 = vmatprep.mubr.msk.f32.mxu1 %vm2032_vm3, %v2033_v8  ;;  %1977 = vmatprep.subr.bf16.mxu0 %v2030_v2  ;;  %v57_v43 = vld [vmem:[%s2377_s1 + $0xb0] sm:$0xff]  ;;  %v58_v44 = vld [vmem:[%s2377_s1 + $0xb8] sm:$0xf]  ;;  %s1711_s17 = sshll.u32 %s2034_s16, 4  ;;  %s1712_s17 = int_to_ptr.vmem [resolvable:$true] %s1711_s17 }
  0x13   :  { %1859 = vmatmul.mubr.msk.f32.vlgmr.msra.gmra.mrb[6].mxu0 %vm70_vm4, %v27_v37  ;;  %1981 = vmatprep.subr.bf16.mxu1 %v2030_v2  ;;  %v29_v45 = vld [vmem:[%s2376_s0 + $0x40] sm:$0xff]  ;;  %v1986_v46 = vpack.c.bf16 %v56_v42, %v55_v41  ;;  %v30_v47 = vld [vmem:[%s2376_s0 + $0x48] sm:$0xff]  ;;  %v1990_v48 = vpack.c.bf16 %v58_v44, %v57_v43  ;;  %v61_v51 = vld [vmem:[%s2377_s1 + $0xd0] sm:$0xff]  ;;  %s2006_s18 = scalar_lea.vmem %s1712_s17, 128  ;;  %p2011_p1 = scmp.lt.s32.totalorder %s1712_s17, %s1712_s17 }
  0x14   :  { %1866 = vmatmul.mubr.msk.f32.vlgmr.msra.gmra.mrb[6].mxu1 %vm70_vm4, %v28_v39  ;;  %1980 = vmatpush3.bf16.msk.msra.mxu0 %vm2073_vm2, %v1978_v38  ;;  %v59_v49 = vld [vmem:[%s2377_s1 + $0xc0] sm:$0xff]  ;;  %v60_v50 = vld [vmem:[%s2377_s1 + $0xc8] sm:$0xf]  ;;  %v62_v52 = vld [vmem:[%s2377_s1 + $0xd8] sm:$0xf]  ;;  %p2007_p0 = scmp.ne.s32.totalorder %s1712_s17, %s2006_s18  ;;  %p2012_p2 = scmp.lt.s32.totalorder %s2006_s18, %s2006_s18 }
  0x15   :  { %1984 = vmatpush3.bf16.msk.msra.mxu1 %vm2073_vm2, %v1982_v40  ;;  %1872 = vmatprep.mubr.msk.f32.mxu0 %vm2032_vm3, %v2033_v8  ;;  %v31_v53 = vld [vmem:[%s2376_s0 + $0x50] sm:$0xff]  ;;  %v1994_v54 = vpack.c.bf16 %v60_v50, %v59_v49  ;;  %v32_v55 = vld [vmem:[%s2376_s0 + $0x58] sm:$0xff]  ;;  %v1998_v56 = vpack.c.bf16 %v62_v52, %v61_v51  ;;  %v33_v57 = vld [vmem:[%s2376_s0 + $0x60] sm:$0xff] }
  0x16   :  { %1879 = vmatprep.mubr.msk.f32.mxu1 %vm2032_vm3, %v2033_v8  ;;  %1985 = vmatprep.subr.bf16.mxu0 %v2030_v2  ;;  %v34_v58 = vld [vmem:[%s2376_s0 + $0x68] sm:$0xff]  ;;  %v1172_v59 = vld [vmem:[%s2379_s3] sm:$0xff]  ;;  %v1174_v35 = vld [vmem:[%s2379_s3 + $0x10] sm:$0xff]  ;;  %p2013_p3 = por %p2012_p2, %p2011_p1 }
  0x17   :  { %1873 = vmatmul.mubr.msk.f32.vlgmr.msra.gmra.mrb[8].mxu0 %vm70_vm4, %v29_v45  ;;  %1989 = vmatprep.subr.bf16.mxu1 %v2030_v2  ;;  %v1173_v60 = vld [vmem:[%s2379_s3 + $0x8] sm:$0xff]  ;;  %v2296_v5 = vld [vmem:[%s2378_s2] ss:$0 sm:$0xff]  ;;  %v1175_v52 = vld [vmem:[%s2379_s3 + $0x18] sm:$0xff] }
  0x18   :  { %1880 = vmatmul.mubr.msk.f32.vlgmr.msra.gmra.mrb[8].mxu1 %vm70_vm4, %v30_v47  ;;  %1988 = vmatpush3.bf16.msk.msra.mxu0 %vm2073_vm2, %v1986_v46  ;;  %p2014_p4 = pnand %p2013_p3, %p2007_p0 }
  0x19   :  { %1992 = vmatpush3.bf16.msk.msra.mxu1 %vm2073_vm2, %v1990_v48  ;;  %1886 = vmatprep.mubr.msk.f32.mxu0 %vm2032_vm3, %v2033_v8 }
  0x1a   :  { %1893 = vmatprep.mubr.msk.f32.mxu1 %vm2032_vm3, %v2033_v8  ;;  %1993 = vmatprep.subr.bf16.mxu0 %v2030_v2 }
  0x1b   :  { %1887 = vmatmul.mubr.msk.f32.vlgmr.msra.gmra.mrb[10].mxu0 %vm70_vm4, %v31_v53  ;;  %1997 = vmatprep.subr.bf16.mxu1 %v2030_v2 }
  0x1c   :  { %1894 = vmatmul.mubr.msk.f32.vlgmr.msra.gmra.mrb[10].mxu1 %vm70_vm4, %v32_v55  ;;  %1996 = vmatpush3.bf16.msk.msra.mxu0 %vm2073_vm2, %v1994_v54  ;;  %v1176_v55 = vld [vmem:[%s2379_s3 + $0x20] sm:$0xff] }
  0x1d   :  { %2000 = vmatpush3.bf16.msk.msra.mxu1 %vm2073_vm2, %v1998_v56  ;;  %1900 = vmatprep.mubr.msk.f32.mxu0 %vm2032_vm3, %v2033_v8 }
  0x1e   :  { %1907 = vmatprep.mubr.msk.f32.mxu1 %vm2032_vm3, %v2033_v8  ;;  %1910 = vmatprep.subr.mxu0 %v2033_v8 }
  0x1f   :  { %1901 = vmatmul.mubr.msk.f32.vlgmr.msra.gmra.mrb[12].mxu0 %vm70_vm4, %v33_v57  ;;  %1915 = vmatprep.subr.mxu1 %v2033_v8 }
  0x20   :  { %1908 = vmatmul.mubr.msk.f32.vlgmr.msra.gmra.mrb[12].mxu1 %vm70_vm4, %v34_v58  ;;  %1912 = vmatprep.mubr.msk.f32.mxu0 %vm2032_vm3, %v2033_v8 }
  0x21   :  { %1917 = vmatprep.mubr.msk.f32.mxu1 %vm2032_vm3, %v2033_v8  ;;  %1911 = vmatpush3.msra.mxu0 %v1172_v59 }
  0x22   :  { %1920 = vmatprep.subr.mxu0 %v2033_v8  ;;  %1916 = vmatpush3.msra.mxu1 %v1173_v60 }
  0x23   :  { %1925 = vmatprep.subr.mxu1 %v2033_v8 }
  0xda   :  { %v144_v61 = vpop.f32.mrb[0].mxu0 }
  0xdb   :  { %v1818_v62 = vpop.f32.mrb[1].mxu0  ;;  %v220_v63 = vpop.f32.mrb[0].mxu1  ;;  %v145_v10 = vadd.f32 %v2296_v5, %v144_v61 }
  0xdc   :  { %v1825_v0 = vpop.f32.mrb[1].mxu1  ;;  %v221_v12 = vadd.f32 %v2296_v5, %v220_v63 }
  0xdd   :  { %v1136_v17 = vmax.f32 %v145_v10, 0.0 }
  0xde   :  { %v296_v1 = vpop.f32.mrb[2].mxu0  ;;  %v1137_v20 = vmax.f32 %v221_v12, 0.0 }
  0xdf   :  { %v1832_v2 = vpop.f32.mrb[3].mxu0  ;;  %v372_v3 = vpop.f32.mrb[2].mxu1  ;;  %v297_v13 = vadd.f32 %v2296_v5, %v296_v1  ;;  %v1151_v29 = vsel %vm1150_vm5, %v1136_v17, -inf }
  0xe0   :  { %v1839_v4 = vpop.f32.mrb[3].mxu1  ;;  %v373_v22 = vadd.f32 %v2296_v5, %v372_v3  ;;  %v1154_v36 = vsel %vm1150_vm5, %v1137_v20, -inf }
  0xe1   :  { %v1138_v21 = vmax.f32 %v297_v13, 0.0 }
  0xe2   :  { %v448_v6 = vpop.f32.mrb[4].mxu0  ;;  %v1139_v38 = vmax.f32 %v373_v22, 0.0 }
  0xe3   :  { %v1846_v7 = vpop.f32.mrb[5].mxu0  ;;  %v524_v9 = vpop.f32.mrb[4].mxu1  ;;  %v449_v25 = vadd.f32 %v2296_v5, %v448_v6  ;;  %v1157_v37 = vsel %vm1150_vm5, %v1138_v21, -inf }
  0xe4   :  { %v1853_v11 = vpop.f32.mrb[5].mxu1  ;;  %v525_v42 = vadd.f32 %v2296_v5, %v524_v9  ;;  %v1160_v56 = vsel %vm1150_vm5, %v1139_v38, -inf  ;;  %v1177_v7 = vld [vmem:[%s2379_s3 + $0x28] sm:$0xff] }
  0xe5   :  { %v1140_v41 = vmax.f32 %v449_v25, 0.0 }
  0xe6   :  { %v600_v14 = vpop.f32.mrb[6].mxu0  ;;  %v1141_v60 = vmax.f32 %v525_v42, 0.0 }
  0xe7   :  { %v676_v15 = vpop.f32.mrb[6].mxu1  ;;  %v1860_v16 = vpop.f32.mrb[7].mxu0  ;;  %v601_v47 = vadd.f32 %v2296_v5, %v600_v14  ;;  %v1163_v59 = vsel %vm1150_vm5, %v1140_v41, -inf }
  0xe8   :  { %v677_v18 = vadd.f32 %v2296_v5, %v676_v15  ;;  %v1867_v19 = vpop.f32.mrb[7].mxu1  ;;  %v1166_v12 = vsel %vm1150_vm5, %v1141_v60, -inf }
  0xe9   :  { %v1142_v1 = vmax.f32 %v601_v47, 0.0 }
  0xea   :  { %v1143_v23 = vmax.f32 %v677_v18, 0.0  ;;  %v752_v24 = vpop.f32.mrb[8].mxu0 }
  0xeb   :  { %v753_v26 = vadd.f32 %v2296_v5, %v752_v24  ;;  %v828_v27 = vpop.f32.mrb[8].mxu1  ;;  %v1874_v28 = vpop.f32.mrb[9].mxu0  ;;  %v1169_v14 = vsel %vm1150_vm5, %v1142_v1, -inf }
  0xec   :  { %v1152_v30 = vsel %vm1150_vm5, %v1143_v23, -inf  ;;  %v829_v31 = vadd.f32 %v2296_v5, %v828_v27  ;;  %v1881_v32 = vpop.f32.mrb[9].mxu1 }
  0xed   :  { %v1153_v33 = vmax.f32 %v1151_v29, %v1152_v30  ;;  %v1144_v34 = vmax.f32 %v753_v26, 0.0 }
  0xee   :  { %v1145_v39 = vmax.f32 %v829_v31, 0.0  ;;  %v904_v40 = vpop.f32.mrb[10].mxu0 }
  0xef   :  { %v1155_v43 = vsel %vm1150_vm5, %v1144_v34, -inf  ;;  %v905_v44 = vadd.f32 %v2296_v5, %v904_v40  ;;  %v980_v45 = vpop.f32.mrb[10].mxu1  ;;  %1913 = vmatmul.mubr.msk.f32.vlgmr.msra.gmra.mrb[14].mxu0 %vm1150_vm5, %v1153_v33  ;;  %v1888_v46 = vpop.f32.mrb[11].mxu0 }
  0xf0   :  { %v1156_v48 = vmax.f32 %v1154_v36, %v1155_v43  ;;  %v1158_v49 = vsel %vm1150_vm5, %v1145_v39, -inf  ;;  %v981_v50 = vadd.f32 %v2296_v5, %v980_v45  ;;  %v1895_v51 = vpop.f32.mrb[11].mxu1  ;;  %1921 = vmatpush3.msra.mxu0 %v1174_v35  ;;  %1922 = vmatprep.mubr.msk.f32.mxu0 %vm2032_vm3, %v2033_v8  ;;  %v1755_v36 = vld [vmem:[%s2380_s4] ss:$0 sm:$0xff] }
  0xf1   :  { %v1159_v53 = vmax.f32 %v1157_v37, %v1158_v49  ;;  %v1146_v54 = vmax.f32 %v905_v44, 0.0  ;;  %1930 = vmatprep.subr.mxu0 %v2033_v8 }
  0xf2   :  { %v1147_v57 = vmax.f32 %v981_v50, 0.0  ;;  %v1056_v58 = vpop.f32.mrb[12].mxu0  ;;  %1918 = vmatmul.mubr.msk.f32.vlgmr.msra.gmra.mrb[14].mxu1 %vm1150_vm5, %v1156_v48 }
  0xf3   :  { %v1161_v61 = vsel %vm1150_vm5, %v1146_v54, -inf  ;;  %v1057_v62 = vadd.f32 %v2296_v5, %v1056_v58  ;;  %v1132_v63 = vpop.f32.mrb[12].mxu1  ;;  %1923 = vmatmul.mubr.msk.f32.vlgmr.msra.gmra.mrb[16].mxu0 %vm1150_vm5, %v1159_v53  ;;  %v1902_v0 = vpop.f32.mrb[13].mxu0  ;;  %1926 = vmatpush3.msra.mxu1 %v1175_v52 }
  0xf4   :  { %v1162_v2 = vmax.f32 %v1160_v56, %v1161_v61  ;;  %v1164_v3 = vsel %vm1150_vm5, %v1147_v57, -inf  ;;  %v1133_v4 = vadd.f32 %v2296_v5, %v1132_v63  ;;  %v1909_v6 = vpop.f32.mrb[13].mxu1  ;;  %1927 = vmatprep.mubr.msk.f32.mxu1 %vm2032_vm3, %v2033_v8  ;;  %1931 = vmatpush3.msra.mxu0 %v1176_v55  ;;  %v1178_v5 = vld [vmem:[%s2379_s3 + $0x30] sm:$0xff] }
  0xf5   :  { %v1165_v9 = vmax.f32 %v1163_v59, %v1164_v3  ;;  %v1148_v10 = vmax.f32 %v1057_v62, 0.0  ;;  %1932 = vmatprep.mubr.msk.f32.mxu0 %vm2032_vm3, %v2033_v8  ;;  %1935 = vmatprep.subr.mxu1 %v2033_v8 }
  0xf6   :  { %v1149_v11 = vmax.f32 %v1133_v4, 0.0  ;;  %1928 = vmatmul.mubr.msk.f32.vlgmr.msra.gmra.mrb[16].mxu1 %vm1150_vm5, %v1162_v2  ;;  %1940 = vmatprep.subr.mxu0 %v2033_v8 }
  0xf7   :  { %v1167_v13 = vsel %vm1150_vm5, %v1148_v10, -inf  ;;  %1933 = vmatmul.mubr.msk.f32.vlgmr.msra.gmra.mrb[18].mxu0 %vm1150_vm5, %v1165_v9  ;;  %1936 = vmatpush3.msra.mxu1 %v1177_v7 }
  0xf8   :  { %v1168_v15 = vmax.f32 %v1166_v12, %v1167_v13  ;;  %v1170_v16 = vsel %vm1150_vm5, %v1149_v11, -inf  ;;  %1937 = vmatprep.mubr.msk.f32.mxu1 %vm2032_vm3, %v2033_v8  ;;  %1941 = vmatpush3.msra.mxu0 %v1178_v5 }
  0xf9   :  { %v1171_v17 = vmax.f32 %v1169_v14, %v1170_v16  ;;  %1942 = vmatprep.mubr.msk.f32.mxu0 %vm2032_vm3, %v2033_v8 }
  0xfa   :  { %1938 = vmatmul.mubr.msk.f32.vlgmr.msra.gmra.mrb[18].mxu1 %vm1150_vm5, %v1168_v15 }
  0xfb   :  { %1943 = vmatmul.mubr.msk.f32.vlgmr.msra.gmra.mrb[20].mxu0 %vm1150_vm5, %v1171_v17 }
 0x1c2   :  { %v1248_v18 = vpop.f32.mrb[14].mxu0 }
 0x1c3   :  { %v1914_v19 = vpop.f32.mrb[15].mxu0 }
 0x1c5   :  { %v1321_v20 = vpop.f32.mrb[14].mxu1 }
 0x1c6   :  { %v1690_v21 = vadd.f32 %v1321_v20, %v1248_v18  ;;  %v1394_v22 = vpop.f32.mrb[16].mxu0  ;;  %v1919_v23 = vpop.f32.mrb[15].mxu1 }
 0x1c7   :  { %v1924_v24 = vpop.f32.mrb[17].mxu0 }
 0x1c8   :  { %v1691_v25 = vadd.f32 %v1690_v21, %v1394_v22 }
 0x1c9   :  { %v1467_v26 = vpop.f32.mrb[16].mxu1 }
 0x1ca   :  { %v1692_v27 = vadd.f32 %v1691_v25, %v1467_v26  ;;  %v1540_v28 = vpop.f32.mrb[18].mxu0  ;;  %v1929_v29 = vpop.f32.mrb[17].mxu1 }
 0x1cb   :  { %v1934_v30 = vpop.f32.mrb[19].mxu0 }
 0x1cc   :  { %v1693_v31 = vadd.f32 %v1692_v27, %v1540_v28 }
 0x1cd   :  { %v1613_v32 = vpop.f32.mrb[18].mxu1 }
 0x1ce   :  { %v1694_v8 = vadd.f32 %v1693_v31, %v1613_v32  ;;  %v1686_v33 = vpop.f32.mrb[20].mxu0  ;;  %v1939_v34 = vpop.f32.mrb[19].mxu1 }
 0x1cf   :  { %v1944_v35 = vpop.f32.mrb[21].mxu0 }
 0x1d0   :  { %v1695_v37 = vadd.f32 %v1694_v8, %v1686_v33 }
 0x1d2   :  { %v1703_v38 = vadd.f32 %v1755_v36, %v1695_v37 }
 0x1d4   :  { %1704 = vst [vmem:[#allocation2] sm:$0xff] %v1703_v38 }
 0x1d5   :  { %2017 = shalt.err (!%p2014_p4)
}
 0x1d6   :  { %s2018_s1 = scalar_lea.hbm %s2381_s5, 128 }
 0x1d7   :  { %p2019_p5 = scmp.ne.s32.totalorder %s2381_s5, %s2018_s1  ;;  %p2022_p6 = scmp.lt.u32.totalorder %s2018_s1, %s2381_s5 }
 0x1d9   :  { %p2024_p7 = pnand %p2022_p6, %p2019_p5 }
 0x1db   :  { %2027 = shalt.err (!%p2024_p7)
}
 0x1dc   :  { %1714 = dma.vmem_to_hbm [thread:$0]  %s1712_s17, 128, %s2381_s5, [#allocation3]  }
 0x1dd   :  { %2028 = dma.done.wait [#allocation3], 128  }
 0x1de   :  { %2029 = vsyncadd [#allocation3], 4294967168 }
 0x1df   :  { %1718 = vsyncpa [#allocation3], 1 }

</bundles_post_ra>
